<compile_context>
chip_gen: v6e
topology: v6e:2x2x1
jax: 0.10.0
libtpu: 0.0.40
codegen_flags: <defaults>
</compile_context>

<pallas_src>
import jax
import jax.numpy as jnp
from jax.experimental import pallas as pl
from jax.experimental.pallas import tpu as pltpu


def _softplus(v):
    # torch.nn.Softplus() with beta=1: log(1 + exp(v)); logaddexp is the stable form.
    return jnp.logaddexp(v, 0.0)


def holes_kernel(x_ref, sp_ref, b_ref, sign_ref, pos_ref, o_ref):
    # x_ref:    (H, TB, F)  batch tile of inputs for all holes
    # sp_ref:   (H, F)      all holes' slope_params (resident across batch tiles)
    # b_ref:    (H, F)      all holes' biases       (resident across batch tiles)
    # sign_ref: (1, F)      +1.0 where monot_outs else -1.0 (shared across holes)
    # pos_ref:  (1, F)      positive_outs mask, 1.0 = True  (shared across holes)
    sp = sp_ref[...].astype(jnp.float32)                 # (H, F)
    slopes = _softplus(sp) * sign_ref[...]               # (H, F), sign-select done via mul
    bias = b_ref[...].astype(jnp.float32)                # (H, F)

    x = x_ref[...].astype(jnp.float32)                   # (H, TB, F), f32 compute (v5e-safe)
    out = x * slopes[:, None, :] + bias[:, None, :]      # (H, TB, F)
    out = jnp.where(pos_ref[...] > 0.5, _softplus(out), out)
    o_ref[...] = out.astype(o_ref.dtype)


def holes_forward(x, slope_params, bias, monot_mask, pos_mask, *, max_batch_tile=512):
    """x: (n_holes, B, F); slope_params/bias: (n_holes, F); masks: (1, F) float32.

    Returns (n_holes, B, F) stacked outputs (== list returned by Holes.forward).
    """
    n_holes, B, F = x.shape

    # Precompute the slope sign in the wrapper: +1.0 / -1.0 per feature.
    sign = (2.0 * monot_mask - 1.0).astype(jnp.float32)  # (1, F)
    pos_mask = pos_mask.astype(jnp.float32)              # (1, F)

    # Batch tiling: whole batch in one step when small (typical), otherwise
    # >=512-row tiles (multiple of 8) with params resident across tiles.
    if B <= max_batch_tile:
        tb = B
        x_p = x
    else:
        tb = max_batch_tile
        pad = (-B) % tb
        x_p = jnp.pad(x, ((0, 0), (0, pad), (0, 0))) if pad else x
    Bp = x_p.shape[1]
    grid = (Bp // tb,)

    out = pl.pallas_call(
        holes_kernel,
        out_shape=jax.ShapeDtypeStruct((n_holes, Bp, F), x.dtype),
        grid_spec=pltpu.PrefetchScalarGridSpec(
            num_scalar_prefetch=0,
            grid=grid,
            in_specs=[
                pl.BlockSpec((n_holes, tb, F), lambda b: (0, b, 0)),  # x batch tile
                pl.BlockSpec((n_holes, F), lambda b: (0, 0)),         # slope_params (resident)
                pl.BlockSpec((n_holes, F), lambda b: (0, 0)),         # bias          (resident)
                pl.BlockSpec((1, F), lambda b: (0, 0)),               # sign          (resident)
                pl.BlockSpec((1, F), lambda b: (0, 0)),               # positive_outs (resident)
            ],
            out_specs=pl.BlockSpec((n_holes, tb, F), lambda b: (0, b, 0)),
        ),
        compiler_params=pltpu.CompilerParams(
            # Batch tiles are independent -> parallel (v7x: sharded across the 2 TCs).
            dimension_semantics=("parallel",),
            vmem_limit_bytes=64 * 1024 * 1024,
        ),
    )(x_p, slope_params, bias, sign, pos_mask)

    if Bp != B:
        out = out[:, :B, :]
    return out  # stacked; equivalent to list(out) from PyTorch Holes.forward


def holes_reference(x, slope_params, bias, monot_mask, pos_mask):
    s = _softplus(slope_params)
    slopes = jnp.where(monot_mask > 0.5, s, -s)                # (n_holes, F)
    out = x * slopes[:, None, :] + bias[:, None, :]
    out = jnp.where(pos_mask[None, :, :] > 0.5, _softplus(out), out)
    return out


if __name__ == "__main__":
    # Small, lane-friendly shapes: n_holes=8 holes, batch=8, input_dim=out_dim=128.
    n_holes, batch, features = 8, 8, 128

    key = jax.random.PRNGKey(0)
    kx, ksp, kb = jax.random.split(key, 3)

    x = jax.random.normal(kx, (n_holes, batch, features), dtype=jnp.float32)
    # Per-hole parameters (MonotIsoLinear: slope_params ~ randn(features), bias ~ randn(features))
    slope_params = jax.random.normal(ksp, (n_holes, features), dtype=jnp.float32)
    bias = jax.random.normal(kb, (n_holes, features), dtype=jnp.float32)

    # Buffers (same for every hole). Mix True/False to exercise both where() branches.
    monot = (jnp.arange(features) % 3 != 0)          # mostly monotone-increasing
    positive = (jnp.arange(features) % 4 == 0)       # some outputs forced positive
    monot_mask = monot.astype(jnp.float32)[None, :]        # (1, F)
    pos_mask = positive.astype(jnp.float32)[None, :]       # (1, F)

    out = holes_forward(x, slope_params, bias, monot_mask, pos_mask)
    out = jax.block_until_ready(out)

    ref = holes_reference(x, slope_params, bias, monot_mask, pos_mask)
    assert out.shape == (n_holes, batch, features)
    assert jnp.allclose(out, ref, atol=1e-5, rtol=1e-5), "mismatch vs reference"

    print("KERNEL_OK")
</pallas_src>

<mosaic_0001>
module attributes {stable_mosaic.version = 11 : i64} {
  func.func @holes_kernel(%arg0: i32, %arg1: memref<8x8x128xf32, #tpu.memory_space<vmem>>, %arg2: memref<8x128xf32, #tpu.memory_space<vmem>>, %arg3: memref<8x128xf32, #tpu.memory_space<vmem>>, %arg4: memref<1x128xf32, #tpu.memory_space<vmem>>, %arg5: memref<1x128xf32, #tpu.memory_space<vmem>>, %arg6: memref<8x8x128xf32, #tpu.memory_space<vmem>>) attributes {dimension_semantics = [#tpu.dimension_semantics<parallel>], iteration_bounds = array<i64: 1>, scalar_prefetch = 0 : i64, scratch_operands = 0 : i64, tpu.core_type = #tpu.core_type<tc>, window_params = [{transform_indices = @transform_0, window_bounds = array<i64: 8, 8, 128>}, {pipeline_mode = #tpu.pipeline_mode<synchronous>, transform_indices = @transform_1, window_bounds = array<i64: 8, 128>}, {pipeline_mode = #tpu.pipeline_mode<synchronous>, transform_indices = @transform_2, window_bounds = array<i64: 8, 128>}, {pipeline_mode = #tpu.pipeline_mode<synchronous>, transform_indices = @transform_3, window_bounds = array<i64: 1, 128>}, {pipeline_mode = #tpu.pipeline_mode<synchronous>, transform_indices = @transform_4, window_bounds = array<i64: 1, 128>}, {transform_indices = @transform_5, window_bounds = array<i64: 8, 8, 128>}]} {
    %c0 = arith.constant 0 : index
    %c0_0 = arith.constant 0 : index
    %0 = vector.load %arg2[%c0, %c0_0] : memref<8x128xf32, #tpu.memory_space<vmem>>, vector<8x128xf32>
    %cst = arith.constant 0.000000e+00 : f32
    %1 = vector.broadcast %cst : f32 to vector<8x128xf32>
    %2 = arith.maximumf %0, %1 : vector<8x128xf32>
    %3 = vector.broadcast %cst : f32 to vector<8x128xf32>
    %4 = arith.subf %0, %3 : vector<8x128xf32>
    %5 = arith.cmpf one, %4, %4 : vector<8x128xf32>
    %6 = vector.broadcast %cst : f32 to vector<8x128xf32>
    %7 = arith.addf %0, %6 : vector<8x128xf32>
    %8 = math.absf %4 : vector<8x128xf32>
    %cst_1 = arith.constant 0.000000e+00 : f32
    %9 = vector.broadcast %cst_1 : f32 to vector<8x128xf32>
    %10 = arith.subf %9, %8 : vector<8x128xf32>
    %11 = math.exp %10 : vector<8x128xf32>
    %12 = math.log1p %11 : vector<8x128xf32>
    %13 = arith.addf %2, %12 : vector<8x128xf32>
    %14 = arith.select %5, %7, %13 : vector<8x128xi1>, vector<8x128xf32>
    %c0_2 = arith.constant 0 : index
    %c0_3 = arith.constant 0 : index
    %15 = vector.load %arg4[%c0_2, %c0_3] : memref<1x128xf32, #tpu.memory_space<vmem>>, vector<1x128xf32>
    %16 = vector.broadcast %15 : vector<1x128xf32> to vector<8x128xf32>
    %17 = arith.mulf %14, %16 : vector<8x128xf32>
    %c0_4 = arith.constant 0 : index
    %c0_5 = arith.constant 0 : index
    %18 = vector.load %arg3[%c0_4, %c0_5] : memref<8x128xf32, #tpu.memory_space<vmem>>, vector<8x128xf32>
    %c0_6 = arith.constant 0 : index
    %c0_7 = arith.constant 0 : index
    %c0_8 = arith.constant 0 : index
    %19 = vector.load %arg1[%c0_6, %c0_7, %c0_8] : memref<8x8x128xf32, #tpu.memory_space<vmem>>, vector<8x8x128xf32>
    %20 = vector.shape_cast %17 : vector<8x128xf32> to vector<8x1x128xf32>
    %21 = vector.broadcast %20 : vector<8x1x128xf32> to vector<8x8x128xf32>
    %22 = arith.mulf %19, %21 : vector<8x8x128xf32>
    %23 = vector.shape_cast %18 : vector<8x128xf32> to vector<8x1x128xf32>
    %24 = vector.broadcast %23 : vector<8x1x128xf32> to vector<8x8x128xf32>
    %25 = arith.addf %22, %24 : vector<8x8x128xf32>
    %c0_9 = arith.constant 0 : index
    %c0_10 = arith.constant 0 : index
    %26 = vector.load %arg5[%c0_9, %c0_10] : memref<1x128xf32, #tpu.memory_space<vmem>>, vector<1x128xf32>
    %cst_11 = arith.constant 5.000000e-01 : f32
    %27 = vector.broadcast %cst_11 : f32 to vector<1x128xf32>
    %28 = arith.cmpf ogt, %26, %27 : vector<1x128xf32>
    %cst_12 = arith.constant 0.000000e+00 : f32
    %29 = vector.broadcast %cst_12 : f32 to vector<8x8x128xf32>
    %30 = arith.maximumf %25, %29 : vector<8x8x128xf32>
    %31 = vector.broadcast %cst_12 : f32 to vector<8x8x128xf32>
    %32 = arith.subf %25, %31 : vector<8x8x128xf32>
    %33 = arith.cmpf one, %32, %32 : vector<8x8x128xf32>
    %34 = vector.broadcast %cst_12 : f32 to vector<8x8x128xf32>
    %35 = arith.addf %25, %34 : vector<8x8x128xf32>
    %36 = math.absf %32 : vector<8x8x128xf32>
    %cst_13 = arith.constant 0.000000e+00 : f32
    %37 = vector.broadcast %cst_13 : f32 to vector<8x8x128xf32>
    %38 = arith.subf %37, %36 : vector<8x8x128xf32>
    %39 = math.exp %38 : vector<8x8x128xf32>
    %40 = math.log1p %39 : vector<8x8x128xf32>
    %41 = arith.addf %30, %40 : vector<8x8x128xf32>
    %42 = arith.select %33, %35, %41 : vector<8x8x128xi1>, vector<8x8x128xf32>
    %43 = vector.shape_cast %28 : vector<1x128xi1> to vector<1x1x128xi1>
    %44 = vector.broadcast %43 : vector<1x1x128xi1> to vector<8x8x128xi1>
    %45 = arith.select %44, %42, %25 : vector<8x8x128xi1>, vector<8x8x128xf32>
    %c0_14 = arith.constant 0 : index
    %c0_15 = arith.constant 0 : index
    %c0_16 = arith.constant 0 : index
    %46 = vector.load %arg6[%c0_14, %c0_15, %c0_16] : memref<8x8x128xf32, #tpu.memory_space<vmem>>, vector<8x8x128xf32>
    tpu.vector_store %arg6[%c0_14, %c0_15, %c0_16], %45 {strides = array<i32>} : memref<8x8x128xf32, #tpu.memory_space<vmem>>, vector<8x8x128xf32>,
    return
  }
  func.func @transform_0(%arg0: i32) -> (i32, i32, i32) {
    %c0_i32 = arith.constant 0 : i32
    %c0_i32_0 = arith.constant 0 : i32
    %c0_i32_1 = arith.constant 0 : i32
    return %c0_i32, %arg0, %c0_i32_0 : i32, i32, i32
  }
  func.func @transform_1(%arg0: i32) -> (i32, i32) {
    %c0_i32 = arith.constant 0 : i32
    %c0_i32_0 = arith.constant 0 : i32
    %c0_i32_1 = arith.constant 0 : i32
    return %c0_i32, %c0_i32_0 : i32, i32
  }
  func.func @transform_2(%arg0: i32) -> (i32, i32) {
    %c0_i32 = arith.constant 0 : i32
    %c0_i32_0 = arith.constant 0 : i32
    %c0_i32_1 = arith.constant 0 : i32
    return %c0_i32, %c0_i32_0 : i32, i32
  }
  func.func @transform_3(%arg0: i32) -> (i32, i32) {
    %c0_i32 = arith.constant 0 : i32
    %c0_i32_0 = arith.constant 0 : i32
    %c0_i32_1 = arith.constant 0 : i32
    return %c0_i32, %c0_i32_0 : i32, i32
  }
  func.func @transform_4(%arg0: i32) -> (i32, i32) {
    %c0_i32 = arith.constant 0 : i32
    %c0_i32_0 = arith.constant 0 : i32
    %c0_i32_1 = arith.constant 0 : i32
    return %c0_i32, %c0_i32_0 : i32, i32
  }
  func.func @transform_5(%arg0: i32) -> (i32, i32, i32) {
    %c0_i32 = arith.constant 0 : i32
    %c0_i32_0 = arith.constant 0 : i32
    %c0_i32_1 = arith.constant 0 : i32
    return %c0_i32, %arg0, %c0_i32_0 : i32, i32, i32
  }
}

</mosaic_0001>

<bundles_post_ra>
// kernel: tpu_custom_call.1
= control target key start
LH: loop header
LB: loop body
LE: loop exit
PB: predicated region body
PF: predicated region fallthrough
CT: control target
= control target key end

     0   :  { %10 = vsyncpa [#allocation3], 0  ;;  %s863_s0 = inlined_call_operand.hbm [shape: f32[8,8,128], index: 0, kind: input, shape index: {}]   ;;  %s864_s1 = inlined_call_operand.hbm [shape: f32[8,128], index: 1, kind: input, shape index: {}]   ;;  %s865_s2 = inlined_call_operand.hbm [shape: f32[8,128], index: 2, kind: input, shape index: {}]   ;;  %s866_s3 = inlined_call_operand.vmem [shape: f32[1,128], index: 3, kind: input, shape index: {}]   ;;  %s867_s4 = inlined_call_operand.vmem [shape: f32[1,128], index: 4, kind: input, shape index: {}]   ;;  %s868_s5 = inlined_call_operand.hbm [shape: f32[8,8,128], index: 5, kind: output, shape index: {}]  }
   0x1   :  { %11 = vsyncpa [#allocation6], 0 }
   0x2   :  { %12 = vsyncpa [#allocation4], 0  ;;  %s608_s18 = smov [#allocation5]   ;;  %s609_s20 = smov [#allocation2]  }
   0x3   :  { %s31_s19 = sshll.u32 %s608_s18, 4  ;;  %s18_s21 = sshll.u32 %s609_s20, 4  ;;  %s32_s19 = int_to_ptr.vmem [resolvable:$true] %s31_s19  ;;  %s19_s21 = int_to_ptr.vmem [resolvable:$true] %s18_s21 }
   0x4   :  { %s530_s22 = scalar_lea.vmem %s32_s19, 128  ;;  %p535_p1 = scmp.lt.s32.totalorder %s32_s19, %s32_s19 }
   0x5   :  { %p531_p0 = scmp.ne.s32.totalorder %s32_s19, %s530_s22  ;;  %p536_p2 = scmp.lt.s32.totalorder %s530_s22, %s530_s22 }
   0x7   :  { %p537_p3 = por %p536_p2, %p535_p1 }
   0x9   :  { %p538_p4 = pnand %p537_p3, %p531_p0 }
   0xb   :  { %541 = shalt.err (!%p538_p4)
}
   0xc   :  { %34 = dma.hbm_to_vmem [thread:$0]  %s864_s1, 128, %s32_s19, [#allocation6]  }
   0xd   :  { %s550_s25 = scalar_lea.vmem %s19_s21, 1024  ;;  %p555_p6 = scmp.lt.s32.totalorder %s19_s21, %s19_s21 }
   0xe   :  { %p551_p5 = scmp.ne.s32.totalorder %s19_s21, %s550_s25  ;;  %p556_p7 = scmp.lt.s32.totalorder %s550_s25, %s550_s25 }
  0x10   :  { %p557_p8 = por %p556_p7, %p555_p6 }
  0x12   :  { %p558_p9 = pnand %p557_p8, %p551_p5 }
  0x14   :  { %561 = shalt.err (!%p558_p9)
}
  0x15   :  { %s610_s26 = smov 128   ;;  %s611_s27 = smov 8  }
  0x16   :  { %24 = dma.hbm_to_vmem [thread:$0]  %s863_s0, 1024, %s19_s21, [#allocation3], %s610_s26, %s610_s26, %s611_s27  }
  0x17   :  { %s612_s30 = smov [#allocation7]  }
  0x18   :  { %s41_s6 = sshll.u32 %s612_s30, 4  ;;  %s42_s6 = int_to_ptr.vmem [resolvable:$true] %s41_s6 }
  0x19   :  { %s570_s1 = scalar_lea.vmem %s42_s6, 128  ;;  %p575_p11 = scmp.lt.s32.totalorder %s42_s6, %s42_s6 }
  0x1a   :  { %p571_p10 = scmp.ne.s32.totalorder %s42_s6, %s570_s1  ;;  %p576_p12 = scmp.lt.s32.totalorder %s570_s1, %s570_s1 }
  0x1c   :  { %p577_p13 = por %p576_p12, %p575_p11 }
  0x1e   :  { %p578_p0 = pnand %p577_p13, %p571_p10 }
  0x20   :  { %581 = shalt.err (!%p578_p0)
}
  0x21   :  { %44 = dma.hbm_to_vmem [thread:$0]  %s865_s2, 128, %s42_s6, [#allocation6]  }
  0x22   :  { %602 = dma.done.wait [#allocation3], 1024  }
  0x23   :  { %603 = vsyncadd [#allocation3], 4294966272 }
  0x24   :  { %604 = dma.done.wait [#allocation6], 256  }
  0x25   :  { %605 = vsyncadd [#allocation6], 4294967040  ;;  %v58_v0 = vld [vmem:[#allocation5] sm:$0xff]  ;;  %v613_v7 = vmov 1966171168   ;;  %v99_v9 = vlaneseq  ;;  %v85_v19 = vld [vmem:[#allocation7] sm:$0xff] }
  0x26   :  { %v62_v1 = vand.u32 2147483647, %v58_v0  ;;  %v97_v8 = vunpack.c.l.s4 %v613_v7  ;;  %v59_v16 = vmax.f32 %v58_v0, 0.0  ;;  %vm60_vm1 = vcmp.ne.f32.partialorder %v58_v0, %v58_v0  ;;  %v476_v23 = vld [vmem:[%s866_s3] ss:$0 sm:$0xff]  ;;  %v87_v46 = vld [vmem:[#allocation2 + $0x8] sm:$0xff] }
  0x27   :  { %v100_v13 = vshrl.u32 %v99_v9, 7  ;;  %v193_v24 = vcombine.high %v85_v19, %v85_v19  ;;  %v86_v38 = vld [vmem:[#allocation2] sm:$0xff]  ;;  %v88_v47 = vld [vmem:[#allocation2 + $0x10] sm:$0xff] }
  0x28   :  { %v63_v2 = vsub.f32 0.0, %v62_v1  ;;  %v98_v12 = vunpack.c.0.s8 %v97_v8  ;;  %v90_v56 = vld [vmem:[#allocation2 + $0x20] sm:$0xff] }
  0x29   :  { %v661_v31 = vsub.s32 0, %v100_v13 }
  0x2a   :  { %v64_v3 = vmul.f32 1.442695, %v63_v2  ;;  %v101_v17 = vsub.s32 %v98_v12, %v100_v13 }
  0x2c   :  { %486 = vpow2.f32 %v64_v3  ;;  %v200_v20 = vrot.slane %v85_v19, %v101_v17  ;;  %v207_v29 = vrot.slane %v193_v24, %v101_v17 }
  0x2e   :  { %v216_v26 = vrot.slane %v200_v20, %v101_v17  ;;  %v208_v27 = vcombine.high %v200_v20, %v200_v20  ;;  %v223_v40 = vrot.slane %v207_v29, %v101_v17  ;;  %v209_v41 = vcombine.high %v207_v29, %v207_v29 }
  0x30   :  { %v230_v33 = vrot.slane %v208_v27, %v101_v17  ;;  %v238_v34 = vcombine.high %v216_v26, %v216_v26  ;;  %v245_v39 = vrot.slane %v216_v26, %v661_v31  ;;  %v261_v58 = vrot.slane %v223_v40, %v661_v31 }
  0x31   :  { %v237_v60 = vrot.slane %v209_v41, %v101_v17  ;;  %v239_v12 = vcombine.high %v223_v40, %v223_v40 }
  0x32   :  { %v249_v44 = vrot.slane %v230_v33, %v661_v31  ;;  %v253_v48 = vrot.slane %v238_v34, %v661_v31  ;;  %v240_v49 = vcombine.high %v230_v33, %v230_v33 }
  0x33   :  { %v241_v24 = vcombine.high %v237_v60, %v237_v60  ;;  %v269_v27 = vrot.slane %v239_v12, %v661_v31 }
  0x34   :  { %v257_v2 = vrot.slane %v240_v49, %v661_v31 }
  0x39   :  { %v487_v4 = vpop.eup %486 }
  0x3a   :  { %v66_v5 = vadd.f32 1.0, %v487_v4  ;;  %v69_v6 = vmul.f32 -0.5, %v487_v4  ;;  %v72_v11 = vand.u32 2147483647, %v487_v4 }
  0x3c   :  { %488 = vlog2.f32 %v66_v5  ;;  %v70_v10 = vadd.f32 1.0, %v69_v6  ;;  %vm73_vm0 = vcmp.lt.f32.partialorder %v72_v11, 0.0004427343  ;;  %v265_v11 = vrot.slane %v237_v60, %v661_v31 }
  0x3e   :  { %v71_v14 = vmul.f32 %v487_v4, %v70_v10  ;;  %v91_v4 = vld [vmem:[#allocation2 + $0x28] sm:$0xff] }
  0x49   :  { %v489_v15 = vpop.eup %488 }
  0x4a   :  { %v68_v18 = vmul.f32 0.6931472, %v489_v15 }
  0x4c   :  { %v74_v21 = vsel %vm73_vm0, %v71_v14, %v68_v18 }
  0x4d   :  { %v75_v22 = vadd.f32 %v74_v21, %v59_v16 }
  0x4f   :  { %v76_v25 = vsel %vm60_vm1, %v58_v0, %v75_v22  ;;  %v89_v0 = vld [vmem:[#allocation2 + $0x18] sm:$0xff] }
  0x50   :  { %v84_v28 = vmul.f32 %v476_v23, %v76_v25  ;;  %v92_v23 = vld [vmem:[#allocation2 + $0x30] sm:$0xff] }
  0x52   :  { %v102_v30 = vrot.slane %v84_v28, %v101_v17  ;;  %v95_v32 = vcombine.high %v84_v28, %v84_v28 }
  0x54   :  { %v118_v35 = vrot.slane %v102_v30, %v101_v17  ;;  %v110_v36 = vcombine.high %v102_v30, %v102_v30  ;;  %v109_v37 = vrot.slane %v95_v32, %v101_v17 }
  0x56   :  { %v147_v42 = vrot.slane %v118_v35, %v661_v31  ;;  %v132_v43 = vrot.slane %v110_v36, %v101_v17  ;;  %v140_v45 = vcombine.high %v118_v35, %v118_v35  ;;  %v125_v50 = vrot.slane %v109_v37, %v101_v17  ;;  %v93_v35 = vld [vmem:[#allocation2 + $0x38] sm:$0xff] }
  0x57   :  { %v111_v51 = vcombine.high %v109_v37, %v109_v37 }
  0x58   :  { %v184_v52 = vmul.f32 %v147_v42, %v86_v38  ;;  %v151_v53 = vrot.slane %v132_v43, %v661_v31  ;;  %v155_v54 = vrot.slane %v140_v45, %v661_v31  ;;  %v142_v55 = vcombine.high %v132_v43, %v132_v43 }
  0x59   :  { %v163_v57 = vrot.slane %v125_v50, %v661_v31  ;;  %v139_v59 = vrot.slane %v111_v51, %v101_v17  ;;  %v141_v6 = vcombine.high %v125_v50, %v125_v50  ;;  %v273_v38 = vrot.slane %v241_v24, %v661_v31 }
  0x5a   :  { %v671_v61 = vadd.f32 %v245_v39, %v184_v52  ;;  %v185_v62 = vmul.f32 %v151_v53, %v87_v46  ;;  %v186_v63 = vmul.f32 %v155_v54, %v88_v47  ;;  %v159_v1 = vrot.slane %v142_v55, %v661_v31  ;;  %v290_v52 = vld [vmem:[%s867_s4] sm:$0x1]  ;;  %s615_s4 = smov [#allocation8]  }
  0x5b   :  { %v188_v3 = vmul.f32 %v163_v57, %v90_v56  ;;  %v167_v5 = vrot.slane %v139_v59, %v661_v31  ;;  %v171_v19 = vrot.slane %v141_v6, %v661_v31  ;;  %v143_v20 = vcombine.high %v139_v59, %v139_v59  ;;  %s463_s10 = sshll.u32 %s615_s4, 4  ;;  %s464_s10 = int_to_ptr.vmem [resolvable:$true] %s463_s10 }
  0x5c   :  { %v316_v7 = vand.u32 2147483647, %v671_v61  ;;  %v677_v8 = vadd.f32 %v249_v44, %v185_v62  ;;  %v679_v9 = vadd.f32 %v253_v48, %v186_v63  ;;  %v187_v10 = vmul.f32 %v159_v1, %v89_v0  ;;  %s582_s11 = scalar_lea.vmem %s464_s10, 1024  ;;  %p587_p2 = scmp.lt.s32.totalorder %s464_s10, %s464_s10 }
  0x5d   :  { %v683_v15 = vadd.f32 %v261_v58, %v188_v3  ;;  %v189_v16 = vmul.f32 %v167_v5, %v91_v4  ;;  %v190_v34 = vmul.f32 %v171_v19, %v92_v23  ;;  %v175_v36 = vrot.slane %v143_v20, %v661_v31  ;;  %p583_p1 = scmp.ne.s32.totalorder %s464_s10, %s582_s11  ;;  %p588_p3 = scmp.lt.s32.totalorder %s582_s11, %s582_s11 }
  0x5e   :  { %v324_v13 = vsub.f32 0.0, %v316_v7  ;;  %v317_v14 = vand.u32 2147483647, %v677_v8  ;;  %v318_v17 = vand.u32 2147483647, %v679_v9  ;;  %v686_v18 = vadd.f32 %v257_v2, %v187_v10 }
  0x5f   :  { %v320_v29 = vand.u32 2147483647, %v683_v15  ;;  %v692_v30 = vadd.f32 %v265_v11, %v189_v16  ;;  %v697_v41 = vadd.f32 %v269_v27, %v190_v34  ;;  %v191_v43 = vmul.f32 %v175_v36, %v93_v35  ;;  %p589_p4 = por %p588_p3, %p587_p2 }
  0x60   :  { %v332_v21 = vmul.f32 1.442695, %v324_v13  ;;  %v325_v22 = vsub.f32 0.0, %v317_v14  ;;  %v326_v25 = vsub.f32 0.0, %v318_v17  ;;  %v319_v26 = vand.u32 2147483647, %v686_v18 }
  0x61   :  { %v328_v37 = vsub.f32 0.0, %v320_v29  ;;  %v321_v40 = vand.u32 2147483647, %v692_v30  ;;  %v322_v45 = vand.u32 2147483647, %v697_v41  ;;  %v700_v46 = vadd.f32 %v273_v38, %v191_v43  ;;  %p590_p5 = pnand %p589_p4, %p583_p1 }
  0x62   :  { %490 = vpow2.f32 %v332_v21  ;;  %v334_v28 = vmul.f32 1.442695, %v325_v22  ;;  %v336_v32 = vmul.f32 1.442695, %v326_v25  ;;  %v327_v33 = vsub.f32 0.0, %v319_v26 }
  0x63   :  { %v340_v42 = vmul.f32 1.442695, %v328_v37  ;;  %v329_v44 = vsub.f32 0.0, %v321_v40  ;;  %v330_v48 = vsub.f32 0.0, %v322_v45  ;;  %v323_v49 = vand.u32 2147483647, %v700_v46 }
  0x64   :  { %492 = vpow2.f32 %v334_v28  ;;  %v338_v39 = vmul.f32 1.442695, %v327_v33  ;;  %vm291_vm2 = vcmp.gt.f32.partialorder %v290_v52, 0.5  ;;  %v614_v62 = vmov 0  }
  0x65   :  { %494 = vpow2.f32 %v336_v32  ;;  %v342_v47 = vmul.f32 1.442695, %v329_v44  ;;  %v344_v50 = vmul.f32 1.442695, %v330_v48  ;;  %v331_v51 = vsub.f32 0.0, %v323_v49 }
  0x66   :  { %496 = vpow2.f32 %v338_v39  ;;  %v436_v63 = vsel %vm291_vm2, 1, %v614_v62  ;;  %v292_v7 = vmax.f32 %v671_v61, 0.0  ;;  %vm300_vm3 = vcmp.ne.f32.partialorder %v671_v61, %v671_v61 }
  0x67   :  { %498 = vpow2.f32 %v340_v42  ;;  %v346_v53 = vmul.f32 1.442695, %v331_v51  ;;  %v440_v3 = vrot.slane %v436_v63, %v661_v31  ;;  %v293_v13 = vmax.f32 %v677_v8, 0.0 }
  0x68   :  { %500 = vpow2.f32 %v342_v47  ;;  %v294_v31 = vmax.f32 %v679_v9, 0.0  ;;  %v296_v21 = vmax.f32 %v683_v15, 0.0  ;;  %vm301_vm5 = vcmp.ne.f32.partialorder %v677_v8, %v677_v8 }
  0x69   :  { %502 = vpow2.f32 %v344_v50  ;;  %vm720_vm4 = vcmp.eq.s32.totalorder %v440_v3, 1  ;;  %v295_v23 = vmax.f32 %v686_v18, 0.0  ;;  %vm302_vm6 = vcmp.ne.f32.partialorder %v679_v9, %v679_v9 }
  0x6a   :  { %504 = vpow2.f32 %v346_v53  ;;  %v297_v32 = vmax.f32 %v692_v30, 0.0  ;;  %vm303_vm8 = vcmp.ne.f32.partialorder %v686_v18, %v686_v18  ;;  %vm304_vm12 = vcmp.ne.f32.partialorder %v683_v15, %v683_v15 }
  0x6b   :  { %vm305_vm15 = vcmp.ne.f32.partialorder %v692_v30, %v692_v30  ;;  %vm306_vm2 = vcmp.ne.f32.partialorder %v697_v41, %v697_v41 }
  0x6f   :  { %v491_v54 = vpop.eup %490 }
  0x70   :  { %v348_v55 = vadd.f32 1.0, %v491_v54  ;;  %v351_v1 = vmul.f32 -0.5, %v491_v54  ;;  %v354_v17 = vand.u32 2147483647, %v491_v54 }
  0x71   :  { %v493_v56 = vpop.eup %492 }
  0x72   :  { %v495_v57 = vpop.eup %494  ;;  %506 = vlog2.f32 %v348_v55  ;;  %v357_v58 = vadd.f32 1.0, %v493_v56  ;;  %v360_v4 = vmul.f32 -0.5, %v493_v56  ;;  %v352_v12 = vadd.f32 1.0, %v351_v1 }
  0x73   :  { %v366_v59 = vadd.f32 1.0, %v495_v57  ;;  %v497_v60 = vpop.eup %496  ;;  %v369_v10 = vmul.f32 -0.5, %v495_v57  ;;  %v363_v22 = vand.u32 2147483647, %v493_v56  ;;  %v372_v28 = vand.u32 2147483647, %v495_v57 }
  0x74   :  { %508 = vlog2.f32 %v357_v58  ;;  %v706_v0 = vpop.eup %498  ;;  %v375_v2 = vadd.f32 1.0, %v497_v60  ;;  %v378_v14 = vmul.f32 -0.5, %v497_v60  ;;  %v361_v20 = vadd.f32 1.0, %v360_v4 }
  0x75   :  { %510 = vlog2.f32 %v366_v59  ;;  %v384_v5 = vadd.f32 1.0, %v706_v0  ;;  %v710_v6 = vpop.eup %500  ;;  %v387_v24 = vmul.f32 -0.5, %v706_v0  ;;  %v370_v27 = vadd.f32 1.0, %v369_v10 }
  0x76   :  { %512 = vlog2.f32 %v375_v2  ;;  %v393_v11 = vadd.f32 1.0, %v710_v6  ;;  %v718_v16 = vpop.eup %502  ;;  %v381_v29 = vand.u32 2147483647, %v497_v60  ;;  %v353_v33 = vmul.f32 %v491_v54, %v352_v12 }
  0x77   :  { %514 = vlog2.f32 %v384_v5  ;;  %v402_v25 = vadd.f32 1.0, %v718_v16  ;;  %v730_v26 = vpop.eup %504  ;;  %v379_v34 = vadd.f32 1.0, %v378_v14  ;;  %vm736_vm7 = vcmp.lt.f32.partialorder %v354_v17, 0.0004427343 }
  0x78   :  { %516 = vlog2.f32 %v393_v11  ;;  %v411_v35 = vadd.f32 1.0, %v730_v26  ;;  %v362_v38 = vmul.f32 %v493_v56, %v361_v20  ;;  %v390_v39 = vand.u32 2147483647, %v706_v0 }
  0x79   :  { %518 = vlog2.f32 %v402_v25  ;;  %v396_v40 = vmul.f32 -0.5, %v710_v6  ;;  %v388_v43 = vadd.f32 1.0, %v387_v24  ;;  %v399_v44 = vand.u32 2147483647, %v710_v6 }
  0x7a   :  { %520 = vlog2.f32 %v411_v35  ;;  %vm745_vm9 = vcmp.lt.f32.partialorder %v363_v22, 0.0004427343  ;;  %v371_v48 = vmul.f32 %v495_v57, %v370_v27  ;;  %vm749_vm10 = vcmp.lt.f32.partialorder %v372_v28, 0.0004427343 }
  0x7b   :  { %vm753_vm11 = vcmp.lt.f32.partialorder %v381_v29, 0.0004427343  ;;  %v380_v54 = vmul.f32 %v497_v60, %v379_v34  ;;  %v405_v55 = vmul.f32 -0.5, %v718_v16  ;;  %v397_v58 = vadd.f32 1.0, %v396_v40 }
  0x7c   :  { %v414_v59 = vmul.f32 -0.5, %v730_v26  ;;  %v389_v63 = vmul.f32 %v706_v0, %v388_v43  ;;  %vm766_vm13 = vcmp.lt.f32.partialorder %v390_v39, 0.0004427343  ;;  %vm770_vm14 = vcmp.lt.f32.partialorder %v399_v44, 0.0004427343 }
  0x7d   :  { %v408_v0 = vand.u32 2147483647, %v718_v16  ;;  %v406_v14 = vadd.f32 1.0, %v405_v55  ;;  %v398_v20 = vmul.f32 %v710_v6, %v397_v58  ;;  %v417_v27 = vand.u32 2147483647, %v730_v26 }
  0x7e   :  { %v415_v22 = vadd.f32 1.0, %v414_v59  ;;  %v298_v34 = vmax.f32 %v697_v41, 0.0 }
  0x7f   :  { %v507_v36 = vpop.eup %506  ;;  %v407_v35 = vmul.f32 %v718_v16, %v406_v14  ;;  %vm818_vm0 = vcmp.lt.f32.partialorder %v408_v0, 0.0004427343  ;;  %vm418_vm1 = vcmp.lt.f32.partialorder %v417_v27, 0.0004427343 }
  0x80   :  { %v350_v42 = vmul.f32 0.6931472, %v507_v36 }
  0x81   :  { %v509_v45 = vpop.eup %508 }
  0x82   :  { %v511_v51 = vpop.eup %510  ;;  %v356_v52 = vsel %vm736_vm7, %v353_v33, %v350_v42  ;;  %v359_v53 = vmul.f32 0.6931472, %v509_v45 }
  0x83   :  { %v420_v56 = vadd.f32 %v356_v52, %v292_v7  ;;  %v368_v57 = vmul.f32 0.6931472, %v511_v51  ;;  %v513_v60 = vpop.eup %512 }
  0x84   :  { %v365_v62 = vsel %vm745_vm9, %v362_v38, %v359_v53  ;;  %v515_v7 = vpop.eup %514  ;;  %v377_v12 = vmul.f32 0.6931472, %v513_v60 }
  0x85   :  { %v428_v3 = vsel %vm300_vm3, %v671_v61, %v420_v56  ;;  %v421_v4 = vadd.f32 %v365_v62, %v293_v13  ;;  %v374_v5 = vsel %vm749_vm10, %v371_v48, %v368_v57  ;;  %v386_v13 = vmul.f32 0.6931472, %v515_v7  ;;  %v517_v24 = vpop.eup %516 }
  0x86   :  { %v442_v10 = vsel %vm720_vm4, %v428_v3, %v671_v61  ;;  %v422_v11 = vadd.f32 %v374_v5, %v294_v31  ;;  %v383_v31 = vsel %vm753_vm11, %v380_v54, %v377_v12  ;;  %v395_v29 = vmul.f32 0.6931472, %v517_v24  ;;  %v519_v36 = vpop.eup %518 }
  0x87   :  { %450 = vst [vmem:[#allocation8] sm:$0xff] %v442_v10  ;;  %v429_v17 = vsel %vm301_vm5, %v677_v8, %v421_v4  ;;  %v423_v28 = vadd.f32 %v383_v31, %v295_v23  ;;  %v404_v40 = vmul.f32 0.6931472, %v519_v36  ;;  %v521_v42 = vpop.eup %520  ;;  %vm307_vm3 = vcmp.ne.f32.partialorder %v700_v46, %v700_v46 }
  0x88   :  { %v443_v25 = vsel %vm720_vm4, %v429_v17, %v677_v8  ;;  %v430_v61 = vsel %vm302_vm6, %v679_v9, %v422_v11  ;;  %v392_v8 = vsel %vm766_vm13, %v389_v63, %v386_v13  ;;  %v401_v23 = vsel %vm770_vm14, %v398_v20, %v395_v29 }
  0x89   :  { %451 = vst [vmem:[#allocation8 + $0x8] sm:$0xff] %v443_v25  ;;  %v444_v6 = vsel %vm720_vm4, %v430_v61, %v679_v9  ;;  %v424_v33 = vadd.f32 %v392_v8, %v296_v21  ;;  %v431_v9 = vsel %vm303_vm8, %v686_v18, %v423_v28  ;;  %v416_v21 = vmul.f32 %v730_v26, %v415_v22 }
  0x8a   :  { %452 = vst [vmem:[#allocation8 + $0x10] sm:$0xff] %v444_v6  ;;  %v445_v38 = vsel %vm720_vm4, %v431_v9, %v686_v18  ;;  %v425_v39 = vadd.f32 %v401_v23, %v297_v32  ;;  %v299_v26 = vmax.f32 %v700_v46, 0.0  ;;  %v410_v32 = vsel %vm818_vm0, %v407_v35, %v404_v40 }
  0x8b   :  { %v432_v16 = vsel %vm304_vm12, %v683_v15, %v424_v33  ;;  %453 = vst [vmem:[#allocation8 + $0x18] sm:$0xff] %v445_v38  ;;  %v413_v44 = vmul.f32 0.6931472, %v521_v42  ;;  %v426_v45 = vadd.f32 %v410_v32, %v298_v34 }
  0x8c   :  { %v446_v43 = vsel %vm720_vm4, %v432_v16, %v683_v15  ;;  %v433_v18 = vsel %vm305_vm15, %v692_v30, %v425_v39 }
  0x8d   :  { %454 = vst [vmem:[#allocation8 + $0x20] sm:$0xff] %v446_v43  ;;  %v447_v15 = vsel %vm720_vm4, %v433_v18, %v692_v30  ;;  %v419_v47 = vsel %vm418_vm1, %v416_v21, %v413_v44  ;;  %v434_v48 = vsel %vm306_vm2, %v697_v41, %v426_v45 }
  0x8e   :  { %455 = vst [vmem:[#allocation8 + $0x28] sm:$0xff] %v447_v15  ;;  %v427_v49 = vadd.f32 %v419_v47, %v299_v26  ;;  %v448_v50 = vsel %vm720_vm4, %v434_v48, %v697_v41 }
  0x8f   :  { %456 = vst [vmem:[#allocation8 + $0x30] sm:$0xff] %v448_v50 }
  0x90   :  { %v435_v51 = vsel %vm307_vm3, %v700_v46, %v427_v49 }
  0x91   :  { %v449_v30 = vsel %vm720_vm4, %v435_v51, %v700_v46 }
  0x92   :  { %457 = vst [vmem:[#allocation8 + $0x38] sm:$0xff] %v449_v30 }
  0x93   :  { %593 = shalt.err (!%p590_p5)
}
  0x94   :  { %469 = dma.vmem_to_hbm [thread:$0]  %s464_s10, 1024, %s868_s5, [#allocation4], %s610_s26, %s610_s26, %s611_s27  }
  0x95   :  { %606 = dma.done.wait [#allocation4], 1024  }
  0x96   :  { %607 = vsyncadd [#allocation4], 4294966272 }
  0x97   :  { %473 = vsyncpa [#allocation3], 1 }
  0x98   :  { %474 = vsyncpa [#allocation6], 1 }
  0x99   :  { %475 = vsyncpa [#allocation4], 1 }

</bundles_post_ra>
